<compile_context>
chip_gen: v6e
topology: v6e:2x2x1
jax: 0.10.0
libtpu: 0.0.40
codegen_flags: <defaults>
</compile_context>

<pallas_src>
import functools

import jax
import jax.numpy as jnp
from jax.experimental import pallas as pl
from jax.experimental.pallas import tpu as pltpu


def pixelwise_kernel(x_ref, w0_ref, b0_ref, w1_ref, b1_ref, w2_ref, c2_ref,
                     out_ref, *, depth, hw):
    """One batch element per grid step.

    x_ref  : (1, G, D*H*W)  input voxels; channels on sublanes, voxels on lanes
    w0_ref : (16, G)        conv0 weight with BN0 scale folded in
    b0_ref : (16, 1)        folded BN0 bias
    w1_ref : (8, 16)        conv1 weight with BN1 scale folded in
    b1_ref : (8, 1)         folded BN1 bias
    w2_ref : (1, 8)         conv2 weight
    c2_ref : (1, 1)         conv2 bias
    out_ref: (1, 1, H*W)    max-over-depth sigmoid map
    """
    x = x_ref[0]                                                  # (G, D*HW)

    # conv0 + BN0 (folded) + ReLU  -> (16, D*HW)
    h0 = jnp.maximum(
        jnp.dot(w0_ref[...], x, preferred_element_type=jnp.float32)
        + b0_ref[...], 0.0)

    # conv1 + BN1 (folded) + ReLU  -> (8, D*HW)
    h1 = jnp.maximum(
        jnp.dot(w1_ref[...], h0, preferred_element_type=jnp.float32)
        + b1_ref[...], 0.0)

    # conv2 + bias                 -> (1, D*HW) logits
    z = (jnp.dot(w2_ref[...], h1, preferred_element_type=jnp.float32)
         + c2_ref[...])

    # Max over depth on the logits: static, 128-aligned lane slices, reduced
    # as a balanced tree (log2(D) VPU levels instead of a serial chain).
    slabs = [z[:, d * hw:(d + 1) * hw] for d in range(depth)]
    while len(slabs) > 1:
        nxt = [jnp.maximum(slabs[i], slabs[i + 1])
               for i in range(0, len(slabs) - 1, 2)]
        if len(slabs) % 2:
            nxt.append(slabs[-1])
        slabs = nxt
    m = slabs[0]                                                  # (1, HW)

    # sigmoid(max(z)) == max(sigmoid(z)) because sigmoid is monotonic.
    out_ref[0] = 1.0 / (1.0 + jnp.exp(-m))                        # (1, HW)


@jax.jit
def pixelwise_net_pallas(x, w0, b0, w1, b1, w2, c2):
    """x: (B, G, D, H, W) f32 -> (B, 1, H, W) f32 (matches PixelwiseNet.forward)."""
    bsz, g, d, h, w = x.shape
    hw = h * w
    dhw = d * hw
    c0 = w0.shape[0]
    c1 = w1.shape[0]

    # Contiguous reshape only (no transpose, no pad, no extra HBM round trip).
    x2 = x.reshape(bsz, g, dhw)

    kernel = functools.partial(pixelwise_kernel, depth=d, hw=hw)

    out = pl.pallas_call(
        kernel,
        out_shape=jax.ShapeDtypeStruct((bsz, 1, hw), jnp.float32),
        grid_spec=pltpu.PrefetchScalarGridSpec(
            num_scalar_prefetch=0,
            grid=(bsz,),   # one sample per step; parallel steps feed both v7x TCs
            in_specs=[
                pl.BlockSpec((1, g, dhw), lambda b: (b, 0, 0)),
                pl.BlockSpec((c0, g),     lambda b: (0, 0)),
                pl.BlockSpec((c0, 1),     lambda b: (0, 0)),
                pl.BlockSpec((c1, c0),    lambda b: (0, 0)),
                pl.BlockSpec((c1, 1),     lambda b: (0, 0)),
                pl.BlockSpec((1, c1),     lambda b: (0, 0)),
                pl.BlockSpec((1, 1),      lambda b: (0, 0)),
            ],
            out_specs=pl.BlockSpec((1, 1, hw), lambda b: (b, 0, 0)),
        ),
        compiler_params=pltpu.CompilerParams(
            dimension_semantics=("parallel",)),
        cost_estimate=pl.CostEstimate(
            flops=2 * bsz * dhw * (g * c0 + c0 * c1 + c1),
            transcendentals=bsz * hw,
            bytes_accessed=4 * (bsz * g * dhw + bsz * hw
                                + c0 * g + c0 + c1 * c0 + c1 + c1 + 1)),
    )(x2, w0, b0, w1, b1, w2, c2)

    return out.reshape(bsz, 1, h, w)


def fold_conv_bn(w, gamma, beta, mean, var, eps=1e-5):
    """Fold inference-mode BN into the preceding bias-free 1x1x1 conv.

    w: (Cout, Cin).  Returns (w_folded (Cout, Cin), bias (Cout, 1)).
    """
    scale = gamma / jnp.sqrt(var + eps)
    return w * scale[:, None], (beta - mean * scale)[:, None]


def _reference(x, w0, g0, be0, m0, v0, w1, g1, be1, m1, v1, w2, c2, eps=1e-5):
    """Pure-JAX reference following the PyTorch forward exactly (inference BN)."""
    def bn(y, gamma, beta, mean, var):
        s = (1, -1, 1, 1, 1)
        return ((y - mean.reshape(s)) / jnp.sqrt(var.reshape(s) + eps)
                * gamma.reshape(s) + beta.reshape(s))

    y = jnp.einsum('oc,bcdhw->bodhw', w0, x)
    y = jnp.maximum(bn(y, g0, be0, m0, v0), 0.0)
    y = jnp.einsum('oc,bcdhw->bodhw', w1, y)
    y = jnp.maximum(bn(y, g1, be1, m1, v1), 0.0)
    z = jnp.einsum('oc,bcdhw->bodhw', w2, y) + c2.reshape(1, -1, 1, 1, 1)
    p = jax.nn.sigmoid(z[:, 0])                   # squeeze(1) -> (B, D, H, W)
    return jnp.max(p, axis=1, keepdims=True)      # max over depth -> (B, 1, H, W)


if __name__ == "__main__":
    # PixelwiseNet(G=4); input (B, G, D, H, W) = (2, 4, 8, 16, 16)
    B, G, D, H, W = 2, 4, 8, 16, 16
    C0, C1 = 16, 8

    key = jax.random.PRNGKey(0)
    ks = jax.random.split(key, 16)

    x = jax.random.normal(ks[0], (B, G, D, H, W), jnp.float32)

    # 1x1x1 conv weights (PyTorch OIDHW with trailing 1s dropped -> (Cout, Cin))
    w0 = jax.random.normal(ks[1], (C0, G), jnp.float32) * 0.3
    w1 = jax.random.normal(ks[2], (C1, C0), jnp.float32) * 0.2
    w2 = jax.random.normal(ks[3], (1, C1), jnp.float32) * 0.3
    c2 = 0.1 * jax.random.normal(ks[4], (1,), jnp.float32)

    # deterministic BatchNorm3d params / running stats (inference mode)
    g0 = 1.0 + 0.1 * jax.random.normal(ks[5], (C0,), jnp.float32)
    be0 = 0.1 * jax.random.normal(ks[6], (C0,), jnp.float32)
    m0 = 0.1 * jax.random.normal(ks[7], (C0,), jnp.float32)
    v0 = 1.0 + 0.1 * jax.random.uniform(ks[8], (C0,), jnp.float32)

    g1 = 1.0 + 0.1 * jax.random.normal(ks[9], (C1,), jnp.float32)
    be1 = 0.1 * jax.random.normal(ks[10], (C1,), jnp.float32)
    m1 = 0.1 * jax.random.normal(ks[11], (C1,), jnp.float32)
    v1 = 1.0 + 0.1 * jax.random.uniform(ks[12], (C1,), jnp.float32)

    w0f, b0 = fold_conv_bn(w0, g0, be0, m0, v0)
    w1f, b1 = fold_conv_bn(w1, g1, be1, m1, v1)
    c2b = c2.reshape(1, 1)

    out = pixelwise_net_pallas(x, w0f, b0, w1f, b1, w2, c2b)
    out = jax.block_until_ready(out)

    ref = _reference(x, w0, g0, be0, m0, v0, w1, g1, be1, m1, v1, w2, c2)
    assert out.shape == (B, 1, H, W)
    max_err = float(jnp.max(jnp.abs(out - ref)))
    assert jnp.allclose(out, ref, rtol=1e-5, atol=1e-5), (
        "mismatch vs reference: max abs err = %e" % max_err)

    print("KERNEL_OK")
</pallas_src>

<mosaic_0001>
module attributes {stable_mosaic.version = 11 : i64} {
  func.func @pixelwise_kernel(%arg0: i32, %arg1: memref<1x4x2048xf32, #tpu.memory_space<vmem>>, %arg2: memref<16x4xf32, #tpu.memory_space<vmem>>, %arg3: memref<16x1xf32, #tpu.memory_space<vmem>>, %arg4: memref<8x16xf32, #tpu.memory_space<vmem>>, %arg5: memref<8x1xf32, #tpu.memory_space<vmem>>, %arg6: memref<1x8xf32, #tpu.memory_space<vmem>>, %arg7: memref<1x1xf32, #tpu.memory_space<vmem>>, %arg8: memref<1x1x256xf32, #tpu.memory_space<vmem>>) attributes {dimension_semantics = [#tpu.dimension_semantics<parallel>], iteration_bounds = array<i64: 2>, scalar_prefetch = 0 : i64, scratch_operands = 0 : i64, tpu.core_type = #tpu.core_type<tc>, window_params = [{transform_indices = @transform_0, window_bounds = array<i64: 1, 4, 2048>}, {pipeline_mode = #tpu.pipeline_mode<synchronous>, transform_indices = @transform_1, window_bounds = array<i64: 16, 4>}, {pipeline_mode = #tpu.pipeline_mode<synchronous>, transform_indices = @transform_2, window_bounds = array<i64: 16, 1>}, {pipeline_mode = #tpu.pipeline_mode<synchronous>, transform_indices = @transform_3, window_bounds = array<i64: 8, 16>}, {pipeline_mode = #tpu.pipeline_mode<synchronous>, transform_indices = @transform_4, window_bounds = array<i64: 8, 1>}, {pipeline_mode = #tpu.pipeline_mode<synchronous>, transform_indices = @transform_5, window_bounds = array<i64: 1, 8>}, {pipeline_mode = #tpu.pipeline_mode<synchronous>, transform_indices = @transform_6, window_bounds = array<i64: 1, 1>}, {transform_indices = @transform_7, window_bounds = array<i64: 1, 1, 256>}]} {
    %c0 = arith.constant 0 : index
    %c0_0 = arith.constant 0 : index
    %c0_1 = arith.constant 0 : index
    %0 = vector.load %arg1[%c0, %c0_0, %c0_1] : memref<1x4x2048xf32, #tpu.memory_space<vmem>>, vector<1x4x2048xf32>
    %1 = vector.shape_cast %0 : vector<1x4x2048xf32> to vector<4x2048xf32>
    %c0_2 = arith.constant 0 : index
    %c0_3 = arith.constant 0 : index
    %2 = vector.load %arg2[%c0_2, %c0_3] : memref<16x4xf32, #tpu.memory_space<vmem>>, vector<16x4xf32>
    %cst = arith.constant dense<0.000000e+00> : vector<16x2048xf32>
    %3 = tpu.matmul %2, %1, %cst {dimension_numbers = #tpu.dot_dimension_numbers<[1], [0], [0], [1], [0, 0, 1, 1], [], []>} : vector<16x4xf32>, vector<4x2048xf32>, vector<16x2048xf32> -> vector<16x2048xf32>
    %c0_4 = arith.constant 0 : index
    %c0_5 = arith.constant 0 : index
    %4 = vector.load %arg3[%c0_4, %c0_5] : memref<16x1xf32, #tpu.memory_space<vmem>>, vector<16x1xf32>
    %5 = vector.broadcast %4 : vector<16x1xf32> to vector<16x2048xf32>
    %6 = arith.addf %3, %5 : vector<16x2048xf32>
    %cst_6 = arith.constant 0.000000e+00 : f32
    %7 = vector.broadcast %cst_6 : f32 to vector<16x2048xf32>
    %8 = arith.maximumf %6, %7 : vector<16x2048xf32>
    %c0_7 = arith.constant 0 : index
    %c0_8 = arith.constant 0 : index
    %9 = vector.load %arg4[%c0_7, %c0_8] : memref<8x16xf32, #tpu.memory_space<vmem>>, vector<8x16xf32>
    %cst_9 = arith.constant dense<0.000000e+00> : vector<8x2048xf32>
    %10 = tpu.matmul %9, %8, %cst_9 {dimension_numbers = #tpu.dot_dimension_numbers<[1], [0], [0], [1], [0, 0, 1, 1], [], []>} : vector<8x16xf32>, vector<16x2048xf32>, vector<8x2048xf32> -> vector<8x2048xf32>
    %c0_10 = arith.constant 0 : index
    %c0_11 = arith.constant 0 : index
    %11 = vector.load %arg5[%c0_10, %c0_11] : memref<8x1xf32, #tpu.memory_space<vmem>>, vector<8x1xf32>
    %12 = vector.broadcast %11 : vector<8x1xf32> to vector<8x2048xf32>
    %13 = arith.addf %10, %12 : vector<8x2048xf32>
    %cst_12 = arith.constant 0.000000e+00 : f32
    %14 = vector.broadcast %cst_12 : f32 to vector<8x2048xf32>
    %15 = arith.maximumf %13, %14 : vector<8x2048xf32>
    %c0_13 = arith.constant 0 : index
    %c0_14 = arith.constant 0 : index
    %16 = vector.load %arg6[%c0_13, %c0_14] : memref<1x8xf32, #tpu.memory_space<vmem>>, vector<1x8xf32>
    %cst_15 = arith.constant dense<0.000000e+00> : vector<1x2048xf32>
    %17 = tpu.matmul %16, %15, %cst_15 {dimension_numbers = #tpu.dot_dimension_numbers<[1], [0], [0], [1], [0, 0, 1, 1], [], []>} : vector<1x8xf32>, vector<8x2048xf32>, vector<1x2048xf32> -> vector<1x2048xf32>
    %c0_16 = arith.constant 0 : index
    %c0_17 = arith.constant 0 : index
    %18 = vector.load %arg7[%c0_16, %c0_17] : memref<1x1xf32, #tpu.memory_space<vmem>>, vector<1x1xf32>
    %19 = vector.broadcast %18 : vector<1x1xf32> to vector<1x2048xf32>
    %20 = arith.addf %17, %19 : vector<1x2048xf32>
    %21 = vector.extract_strided_slice %20 {offsets = [0, 0], sizes = [1, 256], strides = [1, 1]} : vector<1x2048xf32> to vector<1x256xf32>
    %22 = vector.extract_strided_slice %20 {offsets = [0, 256], sizes = [1, 256], strides = [1, 1]} : vector<1x2048xf32> to vector<1x256xf32>
    %23 = vector.extract_strided_slice %20 {offsets = [0, 512], sizes = [1, 256], strides = [1, 1]} : vector<1x2048xf32> to vector<1x256xf32>
    %24 = vector.extract_strided_slice %20 {offsets = [0, 768], sizes = [1, 256], strides = [1, 1]} : vector<1x2048xf32> to vector<1x256xf32>
    %25 = vector.extract_strided_slice %20 {offsets = [0, 1024], sizes = [1, 256], strides = [1, 1]} : vector<1x2048xf32> to vector<1x256xf32>
    %26 = vector.extract_strided_slice %20 {offsets = [0, 1280], sizes = [1, 256], strides = [1, 1]} : vector<1x2048xf32> to vector<1x256xf32>
    %27 = vector.extract_strided_slice %20 {offsets = [0, 1536], sizes = [1, 256], strides = [1, 1]} : vector<1x2048xf32> to vector<1x256xf32>
    %28 = vector.extract_strided_slice %20 {offsets = [0, 1792], sizes = [1, 256], strides = [1, 1]} : vector<1x2048xf32> to vector<1x256xf32>
    %29 = arith.maximumf %21, %22 : vector<1x256xf32>
    %30 = arith.maximumf %23, %24 : vector<1x256xf32>
    %31 = arith.maximumf %25, %26 : vector<1x256xf32>
    %32 = arith.maximumf %27, %28 : vector<1x256xf32>
    %33 = arith.maximumf %29, %30 : vector<1x256xf32>
    %34 = arith.maximumf %31, %32 : vector<1x256xf32>
    %35 = arith.maximumf %33, %34 : vector<1x256xf32>
    %cst_18 = arith.constant 0.000000e+00 : f32
    %36 = vector.broadcast %cst_18 : f32 to vector<1x256xf32>
    %37 = arith.subf %36, %35 : vector<1x256xf32>
    %38 = math.exp %37 : vector<1x256xf32>
    %cst_19 = arith.constant 1.000000e+00 : f32
    %39 = vector.broadcast %cst_19 : f32 to vector<1x256xf32>
    %40 = arith.addf %39, %38 : vector<1x256xf32>
    %cst_20 = arith.constant 1.000000e+00 : f32
    %41 = vector.broadcast %cst_20 : f32 to vector<1x256xf32>
    %42 = arith.divf %41, %40 : vector<1x256xf32>
    %c0_21 = arith.constant 0 : index
    %c0_22 = arith.constant 0 : index
    %c0_23 = arith.constant 0 : index
    %43 = vector.load %arg8[%c0_21, %c0_22, %c0_23] : memref<1x1x256xf32, #tpu.memory_space<vmem>>, vector<1x1x256xf32>
    %44 = vector.shape_cast %43 : vector<1x1x256xf32> to vector<1x256xf32>
    %45 = vector.shape_cast %42 : vector<1x256xf32> to vector<1x1x256xf32>
    tpu.vector_store %arg8[%c0_21, %c0_22, %c0_23], %45 {strides = array<i32>} : memref<1x1x256xf32, #tpu.memory_space<vmem>>, vector<1x1x256xf32>,
    return
  }
  func.func @transform_0(%arg0: i32) -> (i32, i32, i32) {
    %c0_i32 = arith.constant 0 : i32
    %c0_i32_0 = arith.constant 0 : i32
    %c0_i32_1 = arith.constant 0 : i32
    return %arg0, %c0_i32, %c0_i32_0 : i32, i32, i32
  }
  func.func @transform_1(%arg0: i32) -> (i32, i32) {
    %c0_i32 = arith.constant 0 : i32
    %c0_i32_0 = arith.constant 0 : i32
    %c0_i32_1 = arith.constant 0 : i32
    return %c0_i32, %c0_i32_0 : i32, i32
  }
  func.func @transform_2(%arg0: i32) -> (i32, i32) {
    %c0_i32 = arith.constant 0 : i32
    %c0_i32_0 = arith.constant 0 : i32
    %c0_i32_1 = arith.constant 0 : i32
    return %c0_i32, %c0_i32_0 : i32, i32
  }
  func.func @transform_3(%arg0: i32) -> (i32, i32) {
    %c0_i32 = arith.constant 0 : i32
    %c0_i32_0 = arith.constant 0 : i32
    %c0_i32_1 = arith.constant 0 : i32
    return %c0_i32, %c0_i32_0 : i32, i32
  }
  func.func @transform_4(%arg0: i32) -> (i32, i32) {
    %c0_i32 = arith.constant 0 : i32
    %c0_i32_0 = arith.constant 0 : i32
    %c0_i32_1 = arith.constant 0 : i32
    return %c0_i32, %c0_i32_0 : i32, i32
  }
  func.func @transform_5(%arg0: i32) -> (i32, i32) {
    %c0_i32 = arith.constant 0 : i32
    %c0_i32_0 = arith.constant 0 : i32
    %c0_i32_1 = arith.constant 0 : i32
    return %c0_i32, %c0_i32_0 : i32, i32
  }
  func.func @transform_6(%arg0: i32) -> (i32, i32) {
    %c0_i32 = arith.constant 0 : i32
    %c0_i32_0 = arith.constant 0 : i32
    %c0_i32_1 = arith.constant 0 : i32
    return %c0_i32, %c0_i32_0 : i32, i32
  }
  func.func @transform_7(%arg0: i32) -> (i32, i32, i32) {
    %c0_i32 = arith.constant 0 : i32
    %c0_i32_0 = arith.constant 0 : i32
    %c0_i32_1 = arith.constant 0 : i32
    return %arg0, %c0_i32, %c0_i32_0 : i32, i32, i32
  }
}

</mosaic_0001>

<bundles_post_ra>
// kernel: pixelwise_net_pallas.1
= control target key start
LH: loop header
LB: loop body
LE: loop exit
PB: predicated region body
PF: predicated region fallthrough
CT: control target
= control target key end

     0   :  { %s2427_s26 = smov 0   ;;  %s2639_s0 = inlined_call_operand.vmem [shape: f32[2,4,2048], index: 0, kind: input, shape index: {}]   ;;  %s2640_s1 = inlined_call_operand.vmem [shape: f32[16,4], index: 1, kind: input, shape index: {}]   ;;  %s2641_s2 = inlined_call_operand.vmem [shape: f32[16,1], index: 2, kind: input, shape index: {}]   ;;  %s2642_s3 = inlined_call_operand.vmem [shape: f32[8,16], index: 3, kind: input, shape index: {}]   ;;  %s2643_s4 = inlined_call_operand.vmem [shape: f32[8,1], index: 4, kind: input, shape index: {}]   ;;  %s2644_s5 = inlined_call_operand.vmem [shape: f32[1,8], index: 5, kind: input, shape index: {}]   ;;  %s2645_s6 = inlined_call_operand.<no memory space> [shape: f32[1,1], index: 6, kind: input, shape index: {}]   ;;  %s2646_s7 = inlined_call_operand.vmem [shape: f32[2,1,256], index: 7, kind: output, shape index: {}]  }
   0x1   :  { %v12_v0 = vstv %s2645_s6 }
   0x2   :  { %13 = vst [vmem:[#allocation2] sm:$0x1] %v12_v0 }
   0x3 LB: > { %s2285_s27 = sadd.s32 4294967295, %s2379_s26   ;;  %p2289_p0 = scmp.ge.s32.totalorder %s2379_s26, 1  ;;  %s2379_s26 = sphi %s2427_s26, %s19_s26  }
   0x4   : > { %p239_p1 = scmp.lt.s32.totalorder %s2379_s26, 3 }
   0x6   : > { %p240_p2 = pnand %p2289_p0, %p239_p1 }
   0x7   : > { %p270_p3 = scmp.lt.s32.totalorder (!%p240_p2), %s2285_s27, 1 }
   0x8   : > { %243 = sbr.rel (%p240_p2) target bundleno = 698 (0x2ba), region = 48 }
   0xd   : > { %v2381_v1 = vmov 0.0   ;;  %v290_v2 = vld [vmem:[%s2641_s2 + $0x8] sm:$0xff]  ;;  %s2648_s27 = smov (!%p270_p3, %s2285_s27), 1  ;;  %v2382_v3 = vmov 0   ;;  %v289_v4 = vld [vmem:[%s2641_s2] sm:$0xff]  ;;  %vm324_vm0 = vcmask 1043456  }
   0xe   : > { %421 = vmatprep.mubr.f32.mxu0 %v2381_v1  ;;  %498 = vmatprep.mubr.f32.mxu1 %v2381_v1  ;;  %s2343_s29 = sshll.u32 %s2648_s27, 6  ;;  %v287_v11 = vld [vmem:[%s2640_s1] sm:$0xff]  ;;  %vm317_vm1 = vcmask 31744   ;;  %v288_v16 = vld [vmem:[%s2640_s1 + $0x8] sm:$0xff]  ;;  %vm1012_vm2 = vcmask 130048   ;;  %vm1611_vm3 = vcmask 64512  }
   0xf   : > { %2355 = vset.pattern.permute.xlu0 %v2382_v3  ;;  %2356 = vset.pattern.permute.xlu1 %v2382_v3  ;;  %s2449_s11 = scalar_lea.vmem %s2639_s0, %s2343_s29  ;;  %v1006_v23 = vld [vmem:[%s2643_s4] sm:$0xff]  ;;  %s2292_s22 = sshll.u32 %s2648_s27, 1 }
  0x10   : > { %298 = vperm.xlu0 %2355, %v290_v2   ;;  %v279_v5 = vld [vmem:[%s2449_s11] sm:$0xff]  ;;  %v280_v6 = vld [vmem:[%s2449_s11 + $0x8] sm:$0xff]  ;;  %v281_v7 = vld [vmem:[%s2449_s11 + $0x10] sm:$0xff]  ;;  %1009 = vperm.xlu1 %2356, %v1006_v23   ;;  %s278_s25 = scalar_lea.vmem %s2646_s7, %s2292_s22 }
  0x11   : > { %v309_v8 = vcombine.high %v279_v5, %v279_v5  ;;  %v310_v9 = vcombine.high %v280_v6, %v280_v6  ;;  %v282_v10 = vld [vmem:[%s2449_s11 + $0x18] sm:$0xff]  ;;  %v311_v12 = vcombine.high %v281_v7, %v281_v7  ;;  %v283_v14 = vld [vmem:[%s2449_s11 + $0x20] sm:$0xff]  ;;  %v284_v15 = vld [vmem:[%s2449_s11 + $0x28] sm:$0xff] }
  0x12   : > { %v312_v13 = vcombine.high %v282_v10, %v282_v10  ;;  %v313_v17 = vcombine.high %v283_v14, %v283_v14  ;;  %v314_v18 = vcombine.high %v284_v15, %v284_v15  ;;  %v285_v19 = vld [vmem:[%s2449_s11 + $0x30] sm:$0xff]  ;;  %v286_v20 = vld [vmem:[%s2449_s11 + $0x38] sm:$0xff]  ;;  %v1601_v24 = vld [vmem:[#allocation2] sm:$0x1] }
  0x13   : > { %2293 = vmatprep.subr.msk.mxu0 %vm324_vm0, %v309_v8  ;;  %2297 = vmatprep.subr.msk.mxu1 %vm324_vm0, %v310_v9  ;;  %v315_v21 = vcombine.high %v285_v19, %v285_v19  ;;  %v316_v22 = vcombine.high %v286_v20, %v286_v20  ;;  %v2531_v57 = vld [vmem:[%s2642_s3] sm:$0xff] }
  0x14   : > { %293 = vperm.xlu0 %2355, %v289_v4   ;;  %2294 = vmatpush1.msk.msra.mxu0 %vm324_vm0, %v279_v5 }
  0x15   : > { %2298 = vmatpush1.msk.msra.mxu1 %vm324_vm0, %v280_v6  ;;  %2295 = vmatmul.mubr.msk.f32.vlgmr.msra.gmra.mxu0 %vm317_vm1, %v287_v11 }
  0x16   : > { %2299 = vmatmul.mubr.msk.f32.vlgmr.msra.gmra.mxu1 %vm317_vm1, %v287_v11  ;;  %2301 = vmatprep.subr.msk.mxu0 %vm324_vm0, %v311_v12 }
  0x17   : > { %2305 = vmatprep.subr.msk.mxu1 %vm324_vm0, %v312_v13  ;;  %427 = vmatprep.mubr.f32.mxu0 %v2381_v1 }
  0x18   : > { %504 = vmatprep.mubr.f32.mxu1 %v2381_v1  ;;  %2302 = vmatpush1.msk.msra.mxu0 %vm324_vm0, %v281_v7 }
  0x19   : > { %2306 = vmatpush1.msk.msra.mxu1 %vm324_vm0, %v282_v10  ;;  %2296 = vmatmul.mubr.msk.f32.gmra.mxu0 %vm317_vm1, %v288_v16 }
  0x1a   : > { %2300 = vmatmul.mubr.msk.f32.gmra.mxu1 %vm317_vm1, %v288_v16  ;;  %575 = vmatprep.mubr.f32.mxu0 %v2381_v1 }
  0x1b   : > { %652 = vmatprep.mubr.f32.mxu1 %v2381_v1  ;;  %2309 = vmatprep.subr.msk.mxu0 %vm324_vm0, %v313_v17 }
  0x1c   : > { %2313 = vmatprep.subr.msk.mxu1 %vm324_vm0, %v314_v18  ;;  %1604 = vperm.xlu1 %2356, %v1601_v24  }
  0x1d   : > { %2303 = vmatmul.mubr.msk.f32.vlgmr.msra.gmra.mxu0 %vm317_vm1, %v287_v11 }
  0x1e   : > { %2307 = vmatmul.mubr.msk.f32.vlgmr.msra.gmra.mxu1 %vm317_vm1, %v287_v11  ;;  %581 = vmatprep.mubr.f32.mxu0 %v2381_v1 }
  0x1f   : > { %658 = vmatprep.mubr.f32.mxu1 %v2381_v1  ;;  %2310 = vmatpush1.msk.msra.mxu0 %vm324_vm0, %v283_v14 }
  0x20   : > { %2314 = vmatpush1.msk.msra.mxu1 %vm324_vm0, %v284_v15  ;;  %2317 = vmatprep.subr.msk.mxu0 %vm324_vm0, %v315_v21 }
  0x21   : > { %2321 = vmatprep.subr.msk.mxu1 %vm324_vm0, %v316_v22  ;;  %2304 = vmatmul.mubr.msk.f32.gmra.mxu0 %vm317_vm1, %v288_v16 }
  0x22   : > { %2308 = vmatmul.mubr.msk.f32.gmra.mxu1 %vm317_vm1, %v288_v16  ;;  %729 = vmatprep.mubr.f32.mxu0 %v2381_v1 }
  0x23   : > { %806 = vmatprep.mubr.f32.mxu1 %v2381_v1 }
  0x25   : > { %2311 = vmatmul.mubr.msk.f32.vlgmr.msra.gmra.mxu0 %vm317_vm1, %v287_v11 }
  0x26   : > { %2315 = vmatmul.mubr.msk.f32.vlgmr.msra.gmra.mxu1 %vm317_vm1, %v287_v11  ;;  %735 = vmatprep.mubr.f32.mxu0 %v2381_v1 }
  0x27   : > { %812 = vmatprep.mubr.f32.mxu1 %v2381_v1  ;;  %2318 = vmatpush1.msk.msra.mxu0 %vm324_vm0, %v285_v19 }
  0x28   : > { %2322 = vmatpush1.msk.msra.mxu1 %vm324_vm0, %v286_v20 }
  0x29   : > { %2312 = vmatmul.mubr.msk.f32.gmra.mxu0 %vm317_vm1, %v288_v16 }
  0x2a   : > { %2316 = vmatmul.mubr.msk.f32.gmra.mxu1 %vm317_vm1, %v288_v16  ;;  %883 = vmatprep.mubr.f32.mxu0 %v2381_v1 }
  0x2b   : > { %960 = vmatprep.mubr.f32.mxu1 %v2381_v1 }
  0x2d   : > { %2319 = vmatmul.mubr.msk.f32.vlgmr.msra.gmra.mxu0 %vm317_vm1, %v287_v11 }
  0x2e   : > { %2323 = vmatmul.mubr.msk.f32.vlgmr.msra.gmra.mxu1 %vm317_vm1, %v287_v11  ;;  %889 = vmatprep.mubr.f32.mxu0 %v2381_v1 }
  0x2f   : > { %966 = vmatprep.mubr.f32.mxu1 %v2381_v1 }
  0x31   : > { %2320 = vmatmul.mubr.msk.f32.gmra.mxu0 %vm317_vm1, %v288_v16 }
  0x32   : > { %2324 = vmatmul.mubr.msk.f32.gmra.mxu1 %vm317_vm1, %v288_v16  ;;  %1080 = vmatprep.mubr.f32.mxu0 %v2381_v1 }
  0x33   : > { %1151 = vmatprep.mubr.f32.mxu1 %v2381_v1 }
  0x8b   : > { %v2516_v25 = vpop.permute.xlu0 %298 }
  0x8f   : > { %v2518_v32 = vpop.permute.xlu0 %293 }
  0xd5   : > { %v423_v26 = vpop.f32.mrf.mxu0 }
  0xd6   : > { %v500_v27 = vpop.f32.mrf.mxu1  ;;  %v424_v41 = vadd.f32 %v423_v26, %v2518_v32 }
  0xd7   : > { %v425_v28 = vpop.f32.mrf.mxu0  ;;  %v501_v42 = vadd.f32 %v500_v27, %v2518_v32 }
  0xd8   : > { %v502_v29 = vpop.f32.mrf.mxu1  ;;  %v426_v37 = vadd.f32 %v425_v28, %v2518_v32  ;;  %v973_v53 = vmax.f32 %v424_v41, 0.0 }
  0xd9   : > { %v429_v30 = vpop.f32.mrf.mxu0  ;;  %v503_v38 = vadd.f32 %v502_v29, %v2518_v32  ;;  %v975_v54 = vmax.f32 %v501_v42, 0.0 }
  0xda   : > { %v506_v31 = vpop.f32.mrf.mxu1  ;;  %v430_v33 = vadd.f32 %v429_v30, %v2516_v25  ;;  %v974_v51 = vmax.f32 %v426_v37, 0.0 }
  0xdb   : > { %v507_v34 = vadd.f32 %v506_v31, %v2516_v25  ;;  %v431_v35 = vpop.f32.mrf.mxu0  ;;  %v976_v52 = vmax.f32 %v503_v38, 0.0 }
  0xdc   : > { %v508_v36 = vpop.f32.mrf.mxu1  ;;  %v432_v39 = vadd.f32 %v431_v35, %v2516_v25  ;;  %v989_v47 = vmax.f32 %v430_v33, 0.0 }
  0xdd   : > { %v509_v40 = vadd.f32 %v508_v36, %v2516_v25  ;;  %v577_v43 = vpop.f32.mrf.mxu0  ;;  %v991_v48 = vmax.f32 %v507_v34, 0.0 }
  0xde   : > { %v654_v44 = vpop.f32.mrf.mxu1  ;;  %v990_v45 = vmax.f32 %v432_v39, 0.0  ;;  %v578_v3 = vadd.f32 %v577_v43, %v2518_v32 }
  0xdf   : > { %v992_v46 = vmax.f32 %v509_v40, 0.0  ;;  %v579_v49 = vpop.f32.mrf.mxu0  ;;  %v655_v4 = vadd.f32 %v654_v44, %v2518_v32 }
  0xe0   : > { %v656_v50 = vpop.f32.mrf.mxu1  ;;  %1044 = vmatprep.subr.mxu0 %v990_v45  ;;  %v580_v58 = vadd.f32 %v579_v49, %v2518_v32  ;;  %v977_v15 = vmax.f32 %v578_v3, 0.0 }
  0xe1   : > { %1115 = vmatprep.subr.mxu1 %v992_v46  ;;  %v583_v55 = vpop.f32.mrf.mxu0  ;;  %1045 = vmatpush1.msra.mxu0 %v989_v47  ;;  %v657_v63 = vadd.f32 %v656_v50, %v2518_v32  ;;  %v979_v16 = vmax.f32 %v655_v4, 0.0 }
  0xe2   : > { %v660_v56 = vpop.f32.mrf.mxu1  ;;  %1116 = vmatpush1.msra.mxu1 %v991_v48  ;;  %1046 = vmatprep.subr.mxu0 %v974_v51  ;;  %v584_v59 = vadd.f32 %v583_v55, %v2516_v25  ;;  %v978_v13 = vmax.f32 %v580_v58, 0.0 }
  0xe3   : > { %1117 = vmatprep.subr.mxu1 %v976_v52  ;;  %v661_v60 = vadd.f32 %v660_v56, %v2516_v25  ;;  %v585_v61 = vpop.f32.mrf.mxu0  ;;  %1047 = vmatpush1.msra.mxu0 %v973_v53  ;;  %v980_v14 = vmax.f32 %v657_v63, 0.0 }
  0xe4   : > { %v662_v62 = vpop.f32.mrf.mxu1  ;;  %1118 = vmatpush1.msra.mxu1 %v975_v54  ;;  %v586_v0 = vadd.f32 %v585_v61, %v2516_v25  ;;  %2325 = vmatmul.mubr.msk.f32.vlgmr.msra.gmra.mxu0 %vm1012_vm2, %v2531_v57  ;;  %v993_v9 = vmax.f32 %v584_v59, 0.0 }
  0xe5   : > { %v663_v2 = vadd.f32 %v662_v62, %v2516_v25  ;;  %2326 = vmatmul.mubr.msk.f32.vlgmr.msra.gmra.mxu1 %vm1012_vm2, %v2531_v57  ;;  %v731_v5 = vpop.f32.mrf.mxu0  ;;  %1222 = vmatprep.mubr.f32.mxu0 %v2381_v1  ;;  %v995_v10 = vmax.f32 %v661_v60, 0.0 }
  0xe6   : > { %v808_v6 = vpop.f32.mrf.mxu1  ;;  %1293 = vmatprep.mubr.f32.mxu1 %v2381_v1  ;;  %v994_v7 = vmax.f32 %v586_v0, 0.0  ;;  %v732_v28 = vadd.f32 %v731_v5, %v2518_v32 }
  0xe7   : > { %v996_v8 = vmax.f32 %v663_v2, 0.0  ;;  %v733_v11 = vpop.f32.mrf.mxu0  ;;  %v809_v29 = vadd.f32 %v808_v6, %v2518_v32 }
  0xe8   : > { %v810_v12 = vpop.f32.mrf.mxu1  ;;  %1186 = vmatprep.subr.mxu0 %v994_v7  ;;  %v734_v19 = vadd.f32 %v733_v11, %v2518_v32  ;;  %v981_v41 = vmax.f32 %v732_v28, 0.0  ;;  %v2590_v11 = vld [vmem:[%s2644_s5] sm:$0x1] }
  0xe9   : > { %1257 = vmatprep.subr.mxu1 %v996_v8  ;;  %v737_v17 = vpop.f32.mrf.mxu0  ;;  %1187 = vmatpush1.msra.mxu0 %v993_v9  ;;  %v811_v24 = vadd.f32 %v810_v12, %v2518_v32  ;;  %v983_v42 = vmax.f32 %v809_v29, 0.0 }
  0xea   : > { %v814_v18 = vpop.f32.mrf.mxu1  ;;  %1258 = vmatpush1.msra.mxu1 %v995_v10  ;;  %1188 = vmatprep.subr.mxu0 %v978_v13  ;;  %v738_v20 = vadd.f32 %v737_v17, %v2516_v25  ;;  %v982_v39 = vmax.f32 %v734_v19, 0.0 }
  0xeb   : > { %1259 = vmatprep.subr.mxu1 %v980_v14  ;;  %v815_v21 = vadd.f32 %v814_v18, %v2516_v25  ;;  %v739_v22 = vpop.f32.mrf.mxu0  ;;  %1189 = vmatpush1.msra.mxu0 %v977_v15  ;;  %v984_v40 = vmax.f32 %v811_v24, 0.0 }
  0xec   : > { %v816_v23 = vpop.f32.mrf.mxu1  ;;  %1260 = vmatpush1.msra.mxu1 %v979_v16  ;;  %v740_v26 = vadd.f32 %v739_v22, %v2516_v25  ;;  %2327 = vmatmul.mubr.msk.f32.vlgmr.msra.gmra.mxu0 %vm1012_vm2, %v2531_v57  ;;  %v997_v35 = vmax.f32 %v738_v20, 0.0 }
  0xed   : > { %v817_v27 = vadd.f32 %v816_v23, %v2516_v25  ;;  %2328 = vmatmul.mubr.msk.f32.vlgmr.msra.gmra.mxu1 %vm1012_vm2, %v2531_v57  ;;  %v885_v30 = vpop.f32.mrf.mxu0  ;;  %1364 = vmatprep.mubr.f32.mxu0 %v2381_v1  ;;  %v999_v36 = vmax.f32 %v815_v21, 0.0 }
  0xee   : > { %v962_v31 = vpop.f32.mrf.mxu1  ;;  %1435 = vmatprep.mubr.f32.mxu1 %v2381_v1  ;;  %v998_v33 = vmax.f32 %v740_v26, 0.0  ;;  %v886_v53 = vadd.f32 %v885_v30, %v2518_v32 }
  0xef   : > { %v1000_v34 = vmax.f32 %v817_v27, 0.0  ;;  %v887_v37 = vpop.f32.mrf.mxu0  ;;  %v963_v54 = vadd.f32 %v962_v31, %v2518_v32 }
  0xf0   : > { %v964_v38 = vpop.f32.mrf.mxu1  ;;  %1328 = vmatprep.subr.mxu0 %v998_v33  ;;  %v888_v45 = vadd.f32 %v887_v37, %v2518_v32  ;;  %v985_v61 = vmax.f32 %v886_v53, 0.0 }
  0xf1   : > { %1399 = vmatprep.subr.mxu1 %v1000_v34  ;;  %v891_v43 = vpop.f32.mrf.mxu0  ;;  %1329 = vmatpush1.msra.mxu0 %v997_v35  ;;  %v965_v50 = vadd.f32 %v964_v38, %v2518_v32  ;;  %v987_v62 = vmax.f32 %v963_v54, 0.0  ;;  %v2581_v32 = vpop.permute.xlu1 %1009 }
  0xf2   : > { %v968_v44 = vpop.f32.mrf.mxu1  ;;  %1400 = vmatpush1.msra.mxu1 %v999_v36  ;;  %1330 = vmatprep.subr.mxu0 %v982_v39  ;;  %v892_v46 = vadd.f32 %v891_v43, %v2516_v25  ;;  %v986_v60 = vmax.f32 %v888_v45, 0.0 }
  0xf3   : > { %1401 = vmatprep.subr.mxu1 %v984_v40  ;;  %v969_v47 = vadd.f32 %v968_v44, %v2516_v25  ;;  %v893_v48 = vpop.f32.mrf.mxu0  ;;  %1331 = vmatpush1.msra.mxu0 %v981_v41 }
  0xf4   : > { %v970_v49 = vpop.f32.mrf.mxu1  ;;  %1402 = vmatpush1.msra.mxu1 %v983_v42  ;;  %v894_v51 = vadd.f32 %v893_v48, %v2516_v25  ;;  %2329 = vmatmul.mubr.msk.f32.vlgmr.msra.gmra.mxu0 %vm1012_vm2, %v2531_v57  ;;  %v1001_v58 = vmax.f32 %v892_v46, 0.0 }
  0xf5   : > { %v971_v52 = vadd.f32 %v970_v49, %v2516_v25  ;;  %2330 = vmatmul.mubr.msk.f32.vlgmr.msra.gmra.mxu1 %vm1012_vm2, %v2531_v57  ;;  %1506 = vmatprep.mubr.f32.mxu0 %v2381_v1  ;;  %v1003_v59 = vmax.f32 %v969_v47, 0.0  ;;  %v988_v25 = vmax.f32 %v965_v50, 0.0  ;;  %v1607_v50 = vlaneseq }
  0xf6   : > { %1577 = vmatprep.mubr.f32.mxu1 %v2381_v1  ;;  %v1002_v55 = vmax.f32 %v894_v51, 0.0 }
  0xf7   : > { %v1004_v56 = vmax.f32 %v971_v52, 0.0  ;;  %v2627_v52 = vshrl.u32 %v1607_v50, 7  ;;  %vm2229_vm4 = vcmp.lt.s32.totalorder %v1607_v50, 256 }
  0xf8   : > { %1470 = vmatprep.subr.mxu0 %v1002_v55 }
  0xf9   : > { %1541 = vmatprep.subr.mxu1 %v1004_v56  ;;  %1471 = vmatpush1.msra.mxu0 %v1001_v58  ;;  %v1609_v58 = vsub.s32 0, %v2627_v52 }
  0xfa   : > { %1542 = vmatpush1.msra.mxu1 %v1003_v59  ;;  %1472 = vmatprep.subr.mxu0 %v986_v60  ;;  %v1605_v59 = vpop.permute.xlu1 %1604 }
  0xfb   : > { %1543 = vmatprep.subr.mxu1 %v988_v25  ;;  %1473 = vmatpush1.msra.mxu0 %v985_v61  ;;  %v1610_v61 = vrot.slane %v1605_v59, %v1609_v58 }
  0xfc   : > { %1544 = vmatpush1.msra.mxu1 %v987_v62  ;;  %2331 = vmatmul.mubr.msk.f32.vlgmr.msra.gmra.mxu0 %vm1012_vm2, %v2531_v57 }
  0xfd   : > { %2332 = vmatmul.mubr.msk.f32.vlgmr.msra.gmra.mxu1 %vm1012_vm2, %v2531_v57  ;;  %1679 = vmatprep.mubr.f32.mxu0 %v2381_v1 }
  0xfe   : > { %1750 = vmatprep.mubr.f32.mxu1 %v2381_v1 }
 0x1a4   : > { %v1082_v63 = vpop.f32.mrf.mxu0 }
 0x1a5   : > { %v1153_v0 = vpop.f32.mrf.mxu1  ;;  %v1083_v2 = vadd.f32 %v1082_v63, %v2581_v32 }
 0x1a6   : > { %v1154_v3 = vadd.f32 %v1153_v0, %v2581_v32  ;;  %v1084_v4 = vpop.f32.mrf.mxu0 }
 0x1a7   : > { %v1155_v5 = vpop.f32.mrf.mxu1  ;;  %v1085_v6 = vadd.f32 %v1084_v4, %v2581_v32  ;;  %v1584_v8 = vmax.f32 %v1083_v2, 0.0 }
 0x1a8   : > { %v1156_v7 = vadd.f32 %v1155_v5, %v2581_v32  ;;  %v1586_v57 = vmax.f32 %v1154_v3, 0.0 }
 0x1a9   : > { %v1585_v9 = vmax.f32 %v1085_v6, 0.0 }
 0x1aa   : > { %v1587_v10 = vmax.f32 %v1156_v7, 0.0 }
 0x1ab   : > { %1645 = vmatprep.subr.mxu0 %v1585_v9 }
 0x1ac   : > { %1716 = vmatprep.subr.mxu1 %v1587_v10  ;;  %v1224_v12 = vpop.f32.mrf.mxu0  ;;  %1646 = vmatpush1.msra.mxu0 %v1584_v8 }
 0x1ad   : > { %v1295_v13 = vpop.f32.mrf.mxu1  ;;  %1717 = vmatpush1.msra.mxu1 %v1586_v57  ;;  %v1225_v14 = vadd.f32 %v1224_v12, %v2581_v32  ;;  %2333 = vmatmul.mubr.msk.f32.vlgmr.msra.gmra.mxu0 %vm1611_vm3, %v2590_v11 }
 0x1ae   : > { %v1296_v15 = vadd.f32 %v1295_v13, %v2581_v32  ;;  %2334 = vmatmul.mubr.msk.f32.vlgmr.msra.gmra.mxu1 %vm1611_vm3, %v2590_v11  ;;  %v1226_v16 = vpop.f32.mrf.mxu0  ;;  %1821 = vmatprep.mubr.f32.mxu0 %v2381_v1 }
 0x1af   : > { %v1297_v17 = vpop.f32.mrf.mxu1  ;;  %1892 = vmatprep.mubr.f32.mxu1 %v2381_v1  ;;  %v1227_v18 = vadd.f32 %v1226_v16, %v2581_v32  ;;  %v1588_v20 = vmax.f32 %v1225_v14, 0.0 }
 0x1b0   : > { %v1298_v19 = vadd.f32 %v1297_v17, %v2581_v32  ;;  %v1590_v21 = vmax.f32 %v1296_v15, 0.0 }
 0x1b1   : > { %v1589_v22 = vmax.f32 %v1227_v18, 0.0 }
 0x1b2   : > { %v1591_v23 = vmax.f32 %v1298_v19, 0.0 }
 0x1b3   : > { %1787 = vmatprep.subr.mxu0 %v1589_v22 }
 0x1b4   : > { %1858 = vmatprep.subr.mxu1 %v1591_v23  ;;  %v1366_v24 = vpop.f32.mrf.mxu0  ;;  %1788 = vmatpush1.msra.mxu0 %v1588_v20 }
 0x1b5   : > { %v1437_v26 = vpop.f32.mrf.mxu1  ;;  %1859 = vmatpush1.msra.mxu1 %v1590_v21  ;;  %2335 = vmatmul.mubr.msk.f32.vlgmr.msra.gmra.mxu0 %vm1611_vm3, %v2590_v11  ;;  %v1367_v27 = vadd.f32 %v1366_v24, %v2581_v32 }
 0x1b6   : > { %2336 = vmatmul.mubr.msk.f32.vlgmr.msra.gmra.mxu1 %vm1611_vm3, %v2590_v11  ;;  %v1438_v28 = vadd.f32 %v1437_v26, %v2581_v32  ;;  %v1368_v29 = vpop.f32.mrf.mxu0  ;;  %1963 = vmatprep.mubr.f32.mxu0 %v2381_v1 }
 0x1b7   : > { %v1439_v30 = vpop.f32.mrf.mxu1  ;;  %2034 = vmatprep.mubr.f32.mxu1 %v2381_v1  ;;  %v1369_v31 = vadd.f32 %v1368_v29, %v2581_v32  ;;  %v1592_v36 = vmax.f32 %v1367_v27, 0.0 }
 0x1b8   : > { %v1440_v33 = vadd.f32 %v1439_v30, %v2581_v32  ;;  %v1594_v37 = vmax.f32 %v1438_v28, 0.0 }
 0x1b9   : > { %v1593_v34 = vmax.f32 %v1369_v31, 0.0 }
 0x1ba   : > { %v1595_v35 = vmax.f32 %v1440_v33, 0.0 }
 0x1bb   : > { %1929 = vmatprep.subr.mxu0 %v1593_v34 }
 0x1bc   : > { %2000 = vmatprep.subr.mxu1 %v1595_v35  ;;  %v1508_v38 = vpop.f32.mrf.mxu0  ;;  %1930 = vmatpush1.msra.mxu0 %v1592_v36 }
 0x1bd   : > { %v1579_v39 = vpop.f32.mrf.mxu1  ;;  %2001 = vmatpush1.msra.mxu1 %v1594_v37  ;;  %2337 = vmatmul.mubr.msk.f32.vlgmr.msra.gmra.mxu0 %vm1611_vm3, %v2590_v11  ;;  %v1509_v40 = vadd.f32 %v1508_v38, %v2581_v32 }
 0x1be   : > { %2338 = vmatmul.mubr.msk.f32.vlgmr.msra.gmra.mxu1 %vm1611_vm3, %v2590_v11  ;;  %v1580_v41 = vadd.f32 %v1579_v39, %v2581_v32  ;;  %v1510_v42 = vpop.f32.mrf.mxu0  ;;  %2105 = vmatprep.mubr.f32.mxu0 %v2381_v1 }
 0x1bf   : > { %v1581_v43 = vpop.f32.mrf.mxu1  ;;  %2176 = vmatprep.mubr.f32.mxu1 %v2381_v1  ;;  %v1511_v44 = vadd.f32 %v1510_v42, %v2581_v32  ;;  %v1596_v48 = vmax.f32 %v1509_v40, 0.0 }
 0x1c0   : > { %v1582_v45 = vadd.f32 %v1581_v43, %v2581_v32  ;;  %v1598_v49 = vmax.f32 %v1580_v41, 0.0 }
 0x1c1   : > { %v1597_v46 = vmax.f32 %v1511_v44, 0.0 }
 0x1c2   : > { %v1599_v47 = vmax.f32 %v1582_v45, 0.0  ;;  %v2383_v45 = vmov 1966171168  }
 0x1c3   : > { %2071 = vmatprep.subr.mxu0 %v1597_v46  ;;  %v2213_v46 = vunpack.c.l.s4 %v2383_v45 }
 0x1c4   : > { %2142 = vmatprep.subr.mxu1 %v1599_v47  ;;  %2072 = vmatpush1.msra.mxu0 %v1596_v48 }
 0x1c5   : > { %2143 = vmatpush1.msra.mxu1 %v1598_v49  ;;  %2339 = vmatmul.mubr.msk.f32.vlgmr.msra.gmra.mxu0 %vm1611_vm3, %v2590_v11  ;;  %v2214_v47 = vunpack.c.0.s8 %v2213_v46 }
 0x1c6   : > { %2340 = vmatmul.mubr.msk.f32.vlgmr.msra.gmra.mxu1 %vm1611_vm3, %v2590_v11 }
 0x1c7   : > { %v2217_v49 = vsub.s32 %v2214_v47, %v2627_v52 }
 0x26d   : > { %v1681_v1 = vpop.f32.mrf.mxu0 }
 0x26e   : > { %v1752_v51 = vpop.f32.mrf.mxu1  ;;  %v1682_v2 = vadd.f32 %v1681_v1, %v1610_v61 }
 0x26f   : > { %v1683_v53 = vpop.f32.mrf.mxu0  ;;  %v1753_v3 = vadd.f32 %v1752_v51, %v1610_v61 }
 0x270   : > { %v1754_v54 = vpop.f32.mrf.mxu1  ;;  %v1684_v9 = vadd.f32 %v1683_v53, %v1610_v61 }
 0x271   : > { %v1755_v10 = vadd.f32 %v1754_v54, %v1610_v61  ;;  %v2183_v18 = vmax.f32 %v1682_v2, %v1753_v3 }
 0x273   : > { %v2184_v27 = vmax.f32 %v1684_v9, %v1755_v10 }
 0x275   : > { %v1823_v55 = vpop.f32.mrf.mxu0 }
 0x276   : > { %v1894_v56 = vpop.f32.mrf.mxu1  ;;  %v1824_v63 = vadd.f32 %v1823_v55, %v1610_v61 }
 0x277   : > { %v1825_v60 = vpop.f32.mrf.mxu0  ;;  %v1895_v0 = vadd.f32 %v1894_v56, %v1610_v61 }
 0x278   : > { %v1896_v25 = vpop.f32.mrf.mxu1  ;;  %v1826_v4 = vadd.f32 %v1825_v60, %v1610_v61 }
 0x279   : > { %v1897_v5 = vadd.f32 %v1896_v25, %v1610_v61  ;;  %v2185_v11 = vmax.f32 %v1824_v63, %v1895_v0 }
 0x27b   : > { %v2186_v19 = vmax.f32 %v1826_v4, %v1897_v5  ;;  %v2191_v28 = vmax.f32 %v2183_v18, %v2185_v11 }
 0x27d   : > { %v1965_v62 = vpop.f32.mrf.mxu0  ;;  %v2192_v33 = vmax.f32 %v2184_v27, %v2186_v19 }
 0x27e   : > { %v2036_v32 = vpop.f32.mrf.mxu1  ;;  %v1966_v8 = vadd.f32 %v1965_v62, %v1610_v61 }
 0x27f   : > { %v1967_v6 = vpop.f32.mrf.mxu0  ;;  %v2037_v57 = vadd.f32 %v2036_v32, %v1610_v61 }
 0x280   : > { %v2038_v7 = vpop.f32.mrf.mxu1  ;;  %v1968_v14 = vadd.f32 %v1967_v6, %v1610_v61 }
 0x281   : > { %v2039_v15 = vadd.f32 %v2038_v7, %v1610_v61  ;;  %v2187_v22 = vmax.f32 %v1966_v8, %v2037_v57 }
 0x283   : > { %v2188_v29 = vmax.f32 %v1968_v14, %v2039_v15 }
 0x285   : > { %v2107_v12 = vpop.f32.mrf.mxu0 }
 0x286   : > { %v2178_v13 = vpop.f32.mrf.mxu1  ;;  %v2108_v16 = vadd.f32 %v2107_v12, %v1610_v61 }
 0x287   : > { %v2179_v17 = vadd.f32 %v2178_v13, %v1610_v61  ;;  %v2109_v20 = vpop.f32.mrf.mxu0 }
 0x288   : > { %v2180_v21 = vpop.f32.mrf.mxu1  ;;  %v2110_v24 = vadd.f32 %v2109_v20, %v1610_v61 }
 0x289   : > { %v2189_v23 = vmax.f32 %v2108_v16, %v2179_v17  ;;  %v2181_v26 = vadd.f32 %v2180_v21, %v1610_v61 }
 0x28b   : > { %v2193_v30 = vmax.f32 %v2187_v22, %v2189_v23  ;;  %v2190_v31 = vmax.f32 %v2110_v24, %v2181_v26 }
 0x28d   : > { %v2195_v34 = vmax.f32 %v2191_v28, %v2193_v30  ;;  %v2194_v35 = vmax.f32 %v2188_v29, %v2190_v31 }
 0x28f   : > { %v2197_v36 = vsub.f32 0.0, %v2195_v34  ;;  %v2196_v37 = vmax.f32 %v2192_v33, %v2194_v35 }
 0x291   : > { %v2199_v38 = vmul.f32 1.442695, %v2197_v36  ;;  %v2198_v39 = vsub.f32 0.0, %v2196_v37 }
 0x293   : > { %2365 = vpow2.f32 %v2199_v38  ;;  %v2201_v40 = vmul.f32 1.442695, %v2198_v39 }
 0x295   : > { %2367 = vpow2.f32 %v2201_v40 }
 0x2a0   : > { %v2366_v41 = vpop.eup %2365 }
 0x2a1   : > { %v2203_v42 = vadd.f32 1.0, %v2366_v41 }
 0x2a2   : > { %v2368_v43 = vpop.eup %2367 }
 0x2a3   : > { %v2204_v44 = vadd.f32 1.0, %v2368_v43  ;;  %2369 = vrcp.f32 %v2203_v42 }
 0x2a5   : > { %2371 = vrcp.f32 %v2204_v44 }
 0x2b0   : > { %v2370_v48 = vpop.eup %2369 }
 0x2b2   : > { %v2372_v1 = vpop.eup %2371 }
 0x2b3   : > { %v2211_v51 = vcombine.low %v2370_v48, %v2372_v1 }
 0x2b5   : > { %v2218_v53 = vrot.slane %v2211_v51, %v2217_v49 }
 0x2b7   : > { %v2225_v54 = vrot.slane %v2218_v53, %v2217_v49 }
 0x2b9   : > { %2231 = vst.msk [vmem:[%s278_s25] sm:$0x3] %vm2229_vm4, %v2225_v54 }
 0x2ba PF: > { %s19_s26 = sadd.s32 1, %s2379_s26  }
 0x2bb   : > { %p16_p4 = scmp.ge.s32.totalorder %s19_s26, 4  }
 0x2bd   :  { %18 = sbr.rel (!%p16_p4) target bundleno = 3 (0x3), region = 78 }

</bundles_post_ra>
